<compile_context>
chip_gen: v6e
topology: v6e:2x2x1
jax: 0.10.0
libtpu: 0.0.40
codegen_flags: <defaults>
</compile_context>

<pallas_src>
import functools

import jax
import jax.numpy as jnp
from jax.experimental import pallas as pl
from jax.experimental.pallas import tpu as pltpu

LANE = 128
SUBLANE = 8
TARGET_BLOCK_BYTES = 4 << 20   # ~4 MiB per input per grid step.
CHUNK_ROWS = 512               # inner compute chunk (rows), 8-aligned.
MAX_UNROLL_CHUNKS = 16         # cap on unrolled chunk iterations per block.


def _num_tc_splits():
    """2 on dual-TensorCore chips (v7x-class), else 1 (v5e/v6e)."""
    try:
        kind = jax.devices()[0].device_kind.lower()
    except Exception:
        return 1
    if "v7" in kind or "7x" in kind:
        return 2
    return 1


def _floss_kernel(pred_ref, tgt_ref, tp_ref, h_ref, acc_tp, acc_h, *,
                  beta, blk_rows, chunk_rows, nb_per_split, total_rows,
                  need_mask, grouped):
    c = pl.program_id(0)
    i = pl.program_id(1)

    @pl.when(i == 0)
    def _():
        acc_tp[...] = jnp.zeros_like(acc_tp)
        acc_h[...] = jnp.zeros_like(acc_h)

    beta_f = jnp.float32(beta)

    if not grouped:
        # Tiny-input fallback (< 8 rows): accumulator matches the block.
        p = pred_ref[...].astype(jnp.float32)
        t = tgt_ref[...].astype(jnp.float32)
        acc_tp[...] += p * t
        acc_h[...] += p + beta_f * t
    else:
        blk_row_start = (c * nb_per_split + i) * blk_rows
        n_full = blk_rows // chunk_rows
        rem_rows = blk_rows % chunk_rows          # multiple of SUBLANE

        def accum_chunk(r0, nrows, masked):
            # Load + cast + accumulate one chunk; bounded vreg live range.
            p = pred_ref[pl.ds(r0, nrows), :].astype(jnp.float32)
            t = tgt_ref[pl.ds(r0, nrows), :].astype(jnp.float32)
            if masked:
                row_ids = (blk_row_start + r0
                           + jax.lax.broadcasted_iota(jnp.int32, (nrows, LANE), 0))
                valid = row_ids < total_rows
                p = jnp.where(valid, p, jnp.float32(0.0))
                t = jnp.where(valid, t, jnp.float32(0.0))
            pt = p * t
            he = p + beta_f * t
            # Whole-vreg VPU adds only; cross-lane reduce deferred to epilogue.
            acc_tp[...] += pt.reshape(-1, SUBLANE, LANE).sum(axis=0)
            acc_h[...] += he.reshape(-1, SUBLANE, LANE).sum(axis=0)

        def accum_block(masked):
            if n_full > 0:
                def body(j, carry):
                    r0 = pl.multiple_of(j * chunk_rows, chunk_rows)
                    accum_chunk(r0, chunk_rows, masked)
                    return carry
                jax.lax.fori_loop(0, n_full, body, 0, unroll=True)
            if rem_rows:
                accum_chunk(n_full * chunk_rows, rem_rows, masked)

        if need_mask:
            # Only the edge block pays for iota/select; interior blocks fast.
            partial = blk_row_start + blk_rows > total_rows

            @pl.when(partial)
            def _():
                accum_block(True)

            @pl.when(jnp.logical_not(partial))
            def _():
                accum_block(False)
        else:
            accum_block(False)

    @pl.when(i == pl.num_programs(1) - 1)
    def _():
        # Single cross-lane/sublane reduction, once per split.
        tp_ref[...] = jnp.full((1, 1), jnp.sum(acc_tp[...]), jnp.float32)
        h_ref[...] = jnp.full((1, 1), jnp.sum(acc_h[...]), jnp.float32)


def _finalize(tp, h, beta, log_like):
    eps = jnp.float32(1e-10)
    fmeasure = jnp.float32(1.0 + beta) * tp / (h + eps)
    if log_like:
        floss = -jnp.log(fmeasure)   # matches PyTorch: -inf if fmeasure == 0
    else:
        floss = jnp.float32(1.0) - fmeasure
    return floss * jnp.float32(100.0)


def floss_pallas(pred, target, beta=0.5, log_like=False):
    """F-measure loss; pred/target are any-shaped (e.g. NCHW) arrays."""
    assert pred.shape == target.shape

    # Flatten in native dtype (free reshape); the f32 cast happens in-kernel.
    p_flat = jnp.ravel(pred)
    t_flat = jnp.ravel(target)
    n = p_flat.shape[0]

    # Sum the <128-element tail in the wrapper instead of jnp.pad-rewriting
    # both whole tensors; the kernel sees only the lane-aligned prefix.
    tail = n % LANE
    tail_tp = jnp.float32(0.0)
    tail_h = jnp.float32(0.0)
    if tail:
        p_tail = p_flat[n - tail:].astype(jnp.float32)
        t_tail = t_flat[n - tail:].astype(jnp.float32)
        tail_tp = jnp.sum(p_tail * t_tail)
        tail_h = jnp.sum(p_tail + jnp.float32(beta) * t_tail)
        p_flat = p_flat[:n - tail]
        t_flat = t_flat[:n - tail]

    rows = p_flat.shape[0] // LANE
    if rows == 0:
        return _finalize(tail_tp, tail_h, beta, log_like)

    p2 = p_flat.reshape(rows, LANE)
    t2 = t_flat.reshape(rows, LANE)

    p_item = jnp.dtype(p2.dtype).itemsize
    t_item = jnp.dtype(t2.dtype).itemsize
    max_item = max(p_item, t_item)

    # Dtype-aware block size: ~4 MiB/input/step, 8-aligned, <= rows.
    target_rows = max(
        SUBLANE, (TARGET_BLOCK_BYTES // (LANE * max_item)) // SUBLANE * SUBLANE)

    nsplit = _num_tc_splits()
    if rows >= SUBLANE:
        grouped = True
        blk_rows = min(target_rows, (rows // SUBLANE) * SUBLANE)
        nb = pl.cdiv(rows, blk_rows)
        if nsplit > 1:
            # Make nb a multiple of nsplit: no clamped / re-read overflow block.
            nb_even = nsplit * pl.cdiv(nb, nsplit)
            blk_even = pl.cdiv(pl.cdiv(rows, nb_even), SUBLANE) * SUBLANE
            if (nb_even - 1) * blk_even < rows:
                nb, blk_rows = nb_even, blk_even
            else:
                nsplit = 1   # too small to split usefully
    else:
        grouped = False
        nsplit = 1
        blk_rows = rows
        nb = 1

    nb_per_split = nb // nsplit
    need_mask = grouped and (nb * blk_rows != rows)

    # Inner compute chunk: <= MAX_UNROLL_CHUNKS unrolled iterations per block.
    if blk_rows <= CHUNK_ROWS:
        chunk_rows = blk_rows
    else:
        chunk_rows = max(CHUNK_ROWS, pl.cdiv(blk_rows, MAX_UNROLL_CHUNKS))
        chunk_rows = min(blk_rows, pl.cdiv(chunk_rows, SUBLANE) * SUBLANE)

    acc_rows = SUBLANE if grouped else blk_rows

    kernel = functools.partial(
        _floss_kernel, beta=float(beta), blk_rows=blk_rows,
        chunk_rows=chunk_rows, nb_per_split=nb_per_split, total_rows=rows,
        need_mask=need_mask, grouped=grouped)

    def in_map(c, i):
        return (c * nb_per_split + i, 0)

    cost = pl.CostEstimate(
        flops=5 * rows * LANE,
        transcendentals=0,
        bytes_accessed=rows * LANE * (p_item + t_item) + 8 * nsplit)

    if nsplit > 1:
        # Only CORE_PARALLEL actually shards a grid axis across TensorCores.
        dim_sems = (getattr(pltpu, "CORE_PARALLEL", "parallel"),
                    getattr(pltpu, "ARBITRARY", "arbitrary"))
    else:
        dim_sems = ("arbitrary", "arbitrary")

    tp_parts, h_parts = pl.pallas_call(
        kernel,
        out_shape=(jax.ShapeDtypeStruct((nsplit, 1), jnp.float32),
                   jax.ShapeDtypeStruct((nsplit, 1), jnp.float32)),
        grid_spec=pltpu.PrefetchScalarGridSpec(
            num_scalar_prefetch=0,
            grid=(nsplit, nb_per_split),
            in_specs=[
                pl.BlockSpec((blk_rows, LANE), in_map),
                pl.BlockSpec((blk_rows, LANE), in_map),
            ],
            out_specs=[
                pl.BlockSpec((1, 1), lambda c, i: (c, 0)),
                pl.BlockSpec((1, 1), lambda c, i: (c, 0)),
            ],
            scratch_shapes=[
                pltpu.VMEM((acc_rows, LANE), jnp.float32),
                pltpu.VMEM((acc_rows, LANE), jnp.float32),
            ],
        ),
        compiler_params=pltpu.CompilerParams(
            dimension_semantics=dim_sems,
            # 2 inputs x 2 buffers x <=4 MiB + chunk temporaries < 24 MiB;
            # 48 MiB cap fits v5e/v6e (128 MiB) and v7x (64 MiB physical).
            vmem_limit_bytes=48 << 20),
        cost_estimate=cost,
    )(p2, t2)

    # Tiny scalar epilogue: combine per-split partials (+ tail) into the loss.
    tp = jnp.sum(tp_parts) + tail_tp
    h = jnp.sum(h_parts) + tail_h
    return _finalize(tp, h, beta, log_like)


def floss_ref(pred, target, beta=0.5, log_like=False):
    eps = 1e-10
    p = pred.astype(jnp.float32)
    t = target.astype(jnp.float32)
    tp = jnp.sum(p * t)
    h = beta * jnp.sum(t) + jnp.sum(p)
    fmeasure = (1.0 + beta) * tp / (h + eps)
    floss = -jnp.log(fmeasure) if log_like else 1.0 - fmeasure
    return floss * 100.0


if __name__ == "__main__":
    key = jax.random.PRNGKey(0)
    k1, k2, k3, k4, k5, k6 = jax.random.split(key, 6)

    # Primary test: small NCHW shape consistent with segmentation-style FLoss.
    B, C, H, W = 2, 4, 16, 16
    pred = jax.nn.sigmoid(jax.random.normal(k1, (B, C, H, W), jnp.float32))
    target = (jax.random.uniform(k2, (B, C, H, W)) > 0.5).astype(jnp.float32)

    out = jax.block_until_ready(floss_pallas(pred, target, beta=0.5))
    ref = floss_ref(pred, target, beta=0.5)
    assert jnp.allclose(out, ref, rtol=1e-4, atol=1e-4), (out, ref)

    # log_like branch.
    out_log = jax.block_until_ready(
        floss_pallas(pred, target, beta=0.5, log_like=True))
    ref_log = floss_ref(pred, target, beta=0.5, log_like=True)
    assert jnp.allclose(out_log, ref_log, rtol=1e-4, atol=1e-4), (out_log, ref_log)

    # Multi-chunk streaming path (~1.3 MB/input, 5 inner chunks).
    pred2 = jax.nn.sigmoid(jax.random.normal(k3, (2, 8, 128, 160), jnp.float32))
    target2 = (jax.random.uniform(k4, (2, 8, 128, 160)) > 0.5).astype(jnp.float32)
    out2 = jax.block_until_ready(floss_pallas(pred2, target2, beta=0.5))
    ref2 = floss_ref(pred2, target2, beta=0.5)
    assert jnp.allclose(out2, ref2, rtol=1e-4, atol=1e-4), (out2, ref2)

    # Unaligned size: wrapper-side tail + masked partial edge block.
    pred3 = jax.nn.sigmoid(jax.random.normal(k5, (3, 5, 17, 13), jnp.float32))
    target3 = (jax.random.uniform(k6, (3, 5, 17, 13)) > 0.5).astype(jnp.float32)
    out3 = jax.block_until_ready(floss_pallas(pred3, target3, beta=0.5))
    ref3 = floss_ref(pred3, target3, beta=0.5)
    assert jnp.allclose(out3, ref3, rtol=1e-4, atol=1e-4), (out3, ref3)

    # Tiny input (< 8 lane rows): non-grouped fallback path.
    pred4 = jax.nn.sigmoid(jax.random.normal(k1, (1, 1, 4, 160), jnp.float32))
    target4 = (jax.random.uniform(k2, (1, 1, 4, 160)) > 0.5).astype(jnp.float32)
    out4 = jax.block_until_ready(floss_pallas(pred4, target4, beta=0.5))
    ref4 = floss_ref(pred4, target4, beta=0.5)
    assert jnp.allclose(out4, ref4, rtol=1e-4, atol=1e-4), (out4, ref4)

    # bf16 input: native-dtype streaming, in-kernel f32 cast.
    pred5 = pred.astype(jnp.bfloat16)
    out5 = jax.block_until_ready(floss_pallas(pred5, target, beta=0.5))
    ref5 = floss_ref(pred5, target, beta=0.5)
    assert jnp.allclose(out5, ref5, rtol=1e-2, atol=1e-2), (out5, ref5)

    print("KERNEL_OK")
</pallas_src>

<mosaic_0001>
module attributes {stable_mosaic.version = 11 : i64} {
  func.func @_floss_kernel(%arg0: i32, %arg1: i32, %arg2: memref<16x128xf32, #tpu.memory_space<vmem>>, %arg3: memref<16x128xf32, #tpu.memory_space<vmem>>, %arg4: memref<1x1xf32, #tpu.memory_space<vmem>>, %arg5: memref<1x1xf32, #tpu.memory_space<vmem>>, %arg6: memref<8x128xf32, #tpu.memory_space<vmem>>, %arg7: memref<8x128xf32, #tpu.memory_space<vmem>>) attributes {dimension_semantics = [#tpu.dimension_semantics<arbitrary>, #tpu.dimension_semantics<arbitrary>], iteration_bounds = array<i64: 1, 1>, scalar_prefetch = 0 : i64, scratch_operands = 2 : i64, tpu.core_type = #tpu.core_type<tc>, window_params = [{transform_indices = @transform_0, window_bounds = array<i64: 16, 128>}, {transform_indices = @transform_1, window_bounds = array<i64: 16, 128>}, {transform_indices = @transform_2, window_bounds = array<i64: 1, 1>}, {transform_indices = @transform_3, window_bounds = array<i64: 1, 1>}]} {
    %c0_i32 = arith.constant 0 : i32
    %0 = arith.cmpi eq, %arg1, %c0_i32 : i32
    %1 = arith.extui %0 : i1 to i32
    %c0_i32_0 = arith.constant 0 : i32
    %2 = arith.cmpi ne, %1, %c0_i32_0 : i32
    scf.if %2 {
      %cst_15 = arith.constant 0.000000e+00 : f32
      %26 = vector.broadcast %cst_15 : f32 to vector<8x128xf32>
      %c0_16 = arith.constant 0 : index
      %c0_17 = arith.constant 0 : index
      %27 = vector.load %arg6[%c0_16, %c0_17] : memref<8x128xf32, #tpu.memory_space<vmem>>, vector<8x128xf32>
      tpu.vector_store %arg6[%c0_16, %c0_17], %26 {strides = array<i32>} : memref<8x128xf32, #tpu.memory_space<vmem>>, vector<8x128xf32>,
      %cst_18 = arith.constant 0.000000e+00 : f32
      %28 = vector.broadcast %cst_18 : f32 to vector<8x128xf32>
      %c0_19 = arith.constant 0 : index
      %c0_20 = arith.constant 0 : index
      %29 = vector.load %arg7[%c0_19, %c0_20] : memref<8x128xf32, #tpu.memory_space<vmem>>, vector<8x128xf32>
      tpu.vector_store %arg7[%c0_19, %c0_20], %28 {strides = array<i32>} : memref<8x128xf32, #tpu.memory_space<vmem>>, vector<8x128xf32>,
    } else {
    }
    %cst = arith.constant 5.000000e-01 : f32
    %c0_i32_1 = arith.constant 0 : i32
    %c16_i32 = arith.constant 16 : i32
    %3 = arith.muli %c0_i32_1, %c16_i32 : i32
    %4 = tpu.assume_multiple %3, 16 : i32
    %5 = arith.index_cast %4 : i32 to index
    %c0 = arith.constant 0 : index
    %6 = vector.load %arg2[%5, %c0] : memref<16x128xf32, #tpu.memory_space<vmem>>, vector<16x128xf32>
    %7 = arith.index_cast %4 : i32 to index
    %c0_2 = arith.constant 0 : index
    %8 = vector.load %arg3[%7, %c0_2] : memref<16x128xf32, #tpu.memory_space<vmem>>, vector<16x128xf32>
    %9 = arith.mulf %6, %8 : vector<16x128xf32>
    %10 = vector.broadcast %cst : f32 to vector<16x128xf32>
    %11 = arith.mulf %10, %8 : vector<16x128xf32>
    %12 = arith.addf %6, %11 : vector<16x128xf32>
    %c0_3 = arith.constant 0 : index
    %c0_4 = arith.constant 0 : index
    %13 = vector.load %arg6[%c0_3, %c0_4] : memref<8x128xf32, #tpu.memory_space<vmem>>, vector<8x128xf32>
    %14 = vector.shape_cast %9 : vector<16x128xf32> to vector<2x8x128xf32>
    %cst_5 = arith.constant dense<0.000000e+00> : vector<8x128xf32>
    %15 = vector.multi_reduction <add>, %14, %cst_5 [0] : vector<2x8x128xf32> to vector<8x128xf32>
    %16 = arith.addf %13, %15 : vector<8x128xf32>
    %c0_6 = arith.constant 0 : index
    %c0_7 = arith.constant 0 : index
    %17 = vector.load %arg6[%c0_6, %c0_7] : memref<8x128xf32, #tpu.memory_space<vmem>>, vector<8x128xf32>
    tpu.vector_store %arg6[%c0_6, %c0_7], %16 {strides = array<i32>} : memref<8x128xf32, #tpu.memory_space<vmem>>, vector<8x128xf32>,
    %c0_8 = arith.constant 0 : index
    %c0_9 = arith.constant 0 : index
    %18 = vector.load %arg7[%c0_8, %c0_9] : memref<8x128xf32, #tpu.memory_space<vmem>>, vector<8x128xf32>
    %19 = vector.shape_cast %12 : vector<16x128xf32> to vector<2x8x128xf32>
    %cst_10 = arith.constant dense<0.000000e+00> : vector<8x128xf32>
    %20 = vector.multi_reduction <add>, %19, %cst_10 [0] : vector<2x8x128xf32> to vector<8x128xf32>
    %21 = arith.addf %18, %20 : vector<8x128xf32>
    %c0_11 = arith.constant 0 : index
    %c0_12 = arith.constant 0 : index
    %22 = vector.load %arg7[%c0_11, %c0_12] : memref<8x128xf32, #tpu.memory_space<vmem>>, vector<8x128xf32>
    tpu.vector_store %arg7[%c0_11, %c0_12], %21 {strides = array<i32>} : memref<8x128xf32, #tpu.memory_space<vmem>>, vector<8x128xf32>,
    %c1_i32 = arith.constant 1 : i32
    %c0_i32_13 = arith.constant 0 : i32
    %23 = arith.cmpi eq, %arg1, %c0_i32_13 : i32
    %24 = arith.extui %23 : i1 to i32
    %c0_i32_14 = arith.constant 0 : i32
    %25 = arith.cmpi ne, %24, %c0_i32_14 : i32
    scf.if %25 {
      %c0_15 = arith.constant 0 : index
      %c0_16 = arith.constant 0 : index
      %26 = vector.load %arg6[%c0_15, %c0_16] : memref<8x128xf32, #tpu.memory_space<vmem>>, vector<8x128xf32>
      %27 = vector.shape_cast %26 : vector<8x128xf32> to vector<1x8x128xf32>
      %cst_17 = arith.constant dense<0.000000e+00> : vector<1xf32>
      %28 = vector.multi_reduction <add>, %27, %cst_17 [1, 2] : vector<1x8x128xf32> to vector<1xf32>
      %29 = vector.shape_cast %28 : vector<1xf32> to vector<1x1x1xf32>
      %30 = vector.extract %29[0, 0, 0] : f32 from vector<1x1x1xf32>
      %31 = vector.broadcast %30 : f32 to vector<1x1xf32>
      %c0_18 = arith.constant 0 : index
      %c0_19 = arith.constant 0 : index
      %32 = vector.load %arg4[%c0_18, %c0_19] : memref<1x1xf32, #tpu.memory_space<vmem>>, vector<1x1xf32>
      tpu.vector_store %arg4[%c0_18, %c0_19], %31 {strides = array<i32>} : memref<1x1xf32, #tpu.memory_space<vmem>>, vector<1x1xf32>,
      %c0_20 = arith.constant 0 : index
      %c0_21 = arith.constant 0 : index
      %33 = vector.load %arg7[%c0_20, %c0_21] : memref<8x128xf32, #tpu.memory_space<vmem>>, vector<8x128xf32>
      %34 = vector.shape_cast %33 : vector<8x128xf32> to vector<1x8x128xf32>
      %cst_22 = arith.constant dense<0.000000e+00> : vector<1xf32>
      %35 = vector.multi_reduction <add>, %34, %cst_22 [1, 2] : vector<1x8x128xf32> to vector<1xf32>
      %36 = vector.shape_cast %35 : vector<1xf32> to vector<1x1x1xf32>
      %37 = vector.extract %36[0, 0, 0] : f32 from vector<1x1x1xf32>
      %38 = vector.broadcast %37 : f32 to vector<1x1xf32>
      %c0_23 = arith.constant 0 : index
      %c0_24 = arith.constant 0 : index
      %39 = vector.load %arg5[%c0_23, %c0_24] : memref<1x1xf32, #tpu.memory_space<vmem>>, vector<1x1xf32>
      tpu.vector_store %arg5[%c0_23, %c0_24], %38 {strides = array<i32>} : memref<1x1xf32, #tpu.memory_space<vmem>>, vector<1x1xf32>,
    } else {
    }
    return
  }
  func.func @transform_0(%arg0: i32, %arg1: i32) -> (i32, i32) {
    %c1_i32 = arith.constant 1 : i32
    %0 = arith.muli %arg0, %c1_i32 : i32
    %1 = arith.addi %0, %arg1 : i32
    %c0_i32 = arith.constant 0 : i32
    %c0_i32_0 = arith.constant 0 : i32
    return %1, %c0_i32 : i32, i32
  }
  func.func @transform_1(%arg0: i32, %arg1: i32) -> (i32, i32) {
    %c1_i32 = arith.constant 1 : i32
    %0 = arith.muli %arg0, %c1_i32 : i32
    %1 = arith.addi %0, %arg1 : i32
    %c0_i32 = arith.constant 0 : i32
    %c0_i32_0 = arith.constant 0 : i32
    return %1, %c0_i32 : i32, i32
  }
  func.func @transform_2(%arg0: i32, %arg1: i32) -> (i32, i32) {
    %c0_i32 = arith.constant 0 : i32
    %c0_i32_0 = arith.constant 0 : i32
    return %arg0, %c0_i32 : i32, i32
  }
  func.func @transform_3(%arg0: i32, %arg1: i32) -> (i32, i32) {
    %c0_i32 = arith.constant 0 : i32
    %c0_i32_0 = arith.constant 0 : i32
    return %arg0, %c0_i32 : i32, i32
  }
}

</mosaic_0001>

<bundles_post_ra>
// kernel: tpu_custom_call.1
= control target key start
LH: loop header
LB: loop body
LE: loop exit
PB: predicated region body
PF: predicated region fallthrough
CT: control target
= control target key end

     0   :  { %9 = vsyncpa [#allocation5], 0  ;;  %s275_s0 = inlined_call_operand.hbm [shape: f32[16,128], index: 0, kind: input, shape index: {}]   ;;  %s276_s1 = inlined_call_operand.hbm [shape: f32[16,128], index: 1, kind: input, shape index: {}]   ;;  %s277_s2 = inlined_call_operand.hbm [shape: f32[1,1], index: 2, kind: output, shape index: {0}]   ;;  %s278_s3 = inlined_call_operand.hbm [shape: f32[1,1], index: 3, kind: output, shape index: {1}]  }
   0x1   :  { %10 = vsyncpa [#allocation8], 0 }
   0x2   :  { %11 = vsyncpa [#allocation6], 0 }
   0x3   :  { %12 = vsyncpa [#allocation11], 0  ;;  %s235_s12 = smov [#allocation4]  }
   0x4   :  { %s22_s13 = sshll.u32 %s235_s12, 4  ;;  %s23_s13 = int_to_ptr.vmem [resolvable:$true] %s22_s13 }
   0x5   :  { %s155_s14 = scalar_lea.vmem %s23_s13, 256  ;;  %p160_p1 = scmp.lt.s32.totalorder %s23_s13, %s23_s13 }
   0x6   :  { %p156_p0 = scmp.ne.s32.totalorder %s23_s13, %s155_s14  ;;  %p161_p2 = scmp.lt.s32.totalorder %s155_s14, %s155_s14 }
   0x8   :  { %p162_p3 = por %p161_p2, %p160_p1 }
   0xa   :  { %p163_p4 = pnand %p162_p3, %p156_p0 }
   0xc   :  { %166 = shalt.err (!%p163_p4)
}
   0xd   :  { %s236_s15 = smov 128   ;;  %s237_s16 = smov 8  }
   0xe   :  { %28 = dma.hbm_to_vmem [thread:$0]  %s275_s0, 256, %s23_s13, [#allocation5], %s236_s15, %s236_s15, %s237_s16  }
   0xf   :  { %s238_s19 = smov [#allocation7]  }
  0x10   :  { %s38_s20 = sshll.u32 %s238_s19, 4  ;;  %s39_s20 = int_to_ptr.vmem [resolvable:$true] %s38_s20 }
  0x11   :  { %s175_s21 = scalar_lea.vmem %s39_s20, 256  ;;  %p180_p6 = scmp.lt.s32.totalorder %s39_s20, %s39_s20 }
  0x12   :  { %p176_p5 = scmp.ne.s32.totalorder %s39_s20, %s175_s21  ;;  %p181_p7 = scmp.lt.s32.totalorder %s175_s21, %s175_s21 }
  0x14   :  { %p182_p8 = por %p181_p7, %p180_p6 }
  0x16   :  { %p183_p9 = pnand %p182_p8, %p176_p5 }
  0x18   :  { %186 = shalt.err (!%p183_p9)
}
  0x19   :  { %44 = dma.hbm_to_vmem [thread:$0]  %s276_s1, 256, %s39_s20, [#allocation8], %s236_s15, %s236_s15, %s237_s16  }
  0x1a   :  { %227 = dma.done.wait [#allocation5], 256  }
  0x1b   :  { %228 = vsyncadd [#allocation5], 4294967040 }
  0x1c   :  { %229 = dma.done.wait [#allocation8], 256  }
  0x1d   :  { %230 = vsyncadd [#allocation8], 4294967040  ;;  %v61_v0 = vld [vmem:[#allocation4] sm:$0xff]  ;;  %v62_v1 = vld [vmem:[#allocation4 + $0x8] sm:$0xff]  ;;  %s239_s0 = smov [#allocation9]   ;;  %vm93_vm0 = vcmask 0  }
  0x1e   :  { %v63_v2 = vld [vmem:[#allocation7] sm:$0xff]  ;;  %v64_v3 = vld [vmem:[#allocation7 + $0x8] sm:$0xff]  ;;  %s113_s1 = sshll.u32 %s239_s0, 4  ;;  %s240_s25 = smov [#allocation10]   ;;  %s114_s1 = int_to_ptr.vmem [resolvable:$true] %s113_s1 }
  0x1f   :  { %v65_v4 = vmul.f32 %v63_v2, %v61_v0  ;;  %v67_v5 = vmul.f32 0.5, %v63_v2  ;;  %v66_v6 = vmul.f32 %v64_v3, %v62_v1  ;;  %v68_v7 = vmul.f32 0.5, %v64_v3  ;;  %s123_s26 = sshll.u32 %s240_s25, 4  ;;  %s187_s27 = scalar_lea.vmem %s114_s1, 16  ;;  %s124_s26 = int_to_ptr.vmem [resolvable:$true] %s123_s26 }
  0x20   :  { %p188_p10 = scmp.ne.s32.totalorder %s114_s1, %s187_s27  ;;  %s191_s28 = scalar_lea.vmem %s114_s1, 32 }
  0x21   :  { %v69_v8 = vadd.f32 %v67_v5, %v61_v0  ;;  %v72_v9 = vadd.f32 %v66_v6, %v65_v4  ;;  %v70_v10 = vadd.f32 %v68_v7, %v62_v1  ;;  %p192_p11 = scmp.lt.s32.totalorder %s114_s1, %s114_s1  ;;  %p193_p12 = scmp.lt.s32.totalorder %s191_s28, %s187_s27 }
  0x23   :  { %83 = vadd.xlane.f32.xlu0 %v72_v9  ;;  %v76_v11 = vadd.f32 %v70_v10, %v69_v8  ;;  %p194_p13 = por %p193_p12, %p192_p11 }
  0x25   :  { %p195_p0 = pnand %p194_p13, %p188_p10 }
  0x27   :  { %96 = vadd.xlane.f32.xlu0 %v76_v11 }
  0xac   :  { %v84_v12 = vpop.xlane.xlu0 %83 }
  0xad   :  { %v85_v13 = vrot.slane %v84_v12, 4 }
  0xaf   :  { %v86_v14 = vadd.f32 %v85_v13, %v84_v12 }
  0xb0   :  { %v97_v15 = vpop.xlane.xlu0 %96 }
  0xb1   :  { %v87_v16 = vrot.slane %v86_v14, 2  ;;  %v98_v17 = vrot.slane %v97_v15, 4 }
  0xb3   :  { %v99_v18 = vadd.f32 %v98_v17, %v97_v15  ;;  %v88_v19 = vadd.f32 %v87_v16, %v86_v14 }
  0xb5   :  { %v100_v20 = vrot.slane %v99_v18, 2  ;;  %v89_v21 = vrot.slane %v88_v19, 1 }
  0xb7   :  { %v101_v22 = vadd.f32 %v100_v20, %v99_v18  ;;  %v90_v23 = vadd.f32 %v89_v21, %v88_v19 }
  0xb9   :  { %137 = vpush %v90_v23  ;;  %v102_v24 = vrot.slane %v101_v22, 1 }
  0xbb   :  { %v103_v25 = vadd.f32 %v102_v24, %v101_v22 }
  0xbd   :  { %139 = vpush %v103_v25 }
  0xea   :  { %s138_s24 = spop %137 }
  0xeb   :  { %v92_v26 = vstv %s138_s24 }
  0xec   :  { %94 = vst.msk [vmem:[#allocation9] sm:$0x1] %vm93_vm0, %v92_v26 }
  0xed   :  { %198 = shalt.err (!%p195_p0)
}
  0xee   :  { %116 = dma.vmem_to_hbm [thread:$0]  %s114_s1, 16, %s277_s2, [#allocation6]  }
  0xef   :  { %s140_s4 = spop %139  ;;  %s207_s5 = scalar_lea.vmem %s124_s26, 16 }
  0xf0   :  { %v105_v27 = vstv %s140_s4  ;;  %p208_p1 = scmp.ne.s32.totalorder %s124_s26, %s207_s5  ;;  %s211_s6 = scalar_lea.vmem %s124_s26, 32 }
  0xf1   :  { %106 = vst.msk [vmem:[#allocation10] sm:$0x1] %vm93_vm0, %v105_v27  ;;  %p212_p2 = scmp.lt.s32.totalorder %s124_s26, %s124_s26  ;;  %p213_p3 = scmp.lt.s32.totalorder %s211_s6, %s207_s5 }
  0xf3   :  { %p214_p4 = por %p213_p3, %p212_p2 }
  0xf5   :  { %p215_p5 = pnand %p214_p4, %p208_p1 }
  0xf7   :  { %218 = shalt.err (!%p215_p5)
}
  0xf8   :  { %126 = dma.vmem_to_hbm [thread:$0]  %s124_s26, 16, %s278_s3, [#allocation11]  }
  0xf9   :  { %231 = dma.done.wait [#allocation6], 16  }
  0xfa   :  { %232 = vsyncadd [#allocation6], 4294967280 }
  0xfb   :  { %233 = dma.done.wait [#allocation11], 16  }
  0xfc   :  { %234 = vsyncadd [#allocation11], 4294967280 }
  0xfd   :  { %133 = vsyncpa [#allocation5], 1 }
  0xfe   :  { %134 = vsyncpa [#allocation8], 1 }
  0xff   :  { %135 = vsyncpa [#allocation6], 1 }
 0x100   :  { %136 = vsyncpa [#allocation11], 1 }

</bundles_post_ra>
